<compile_context>
chip_gen: v7x
topology: tpu7x:2x2x1
jax: 0.10.0
libtpu: 0.0.40
codegen_flags: <defaults>
</compile_context>

<pallas_src>
import jax
import jax.numpy as jnp
from jax.experimental import pallas as pl
from jax.experimental.pallas import tpu as pltpu

EPS = 1e-5

# Keep double-buffered (input + output) tiles comfortably under the smallest
# default scoped-VMEM limit (32 MiB on v6e/v7x): 4 * TB * F * itemsize <= budget.
_VMEM_TILE_BUDGET = 24 * 1024 * 1024


def _layernorm_kernel(x_ref, o_ref):
    # x_ref/o_ref: (TB, F) tile, resident in VMEM. Rows are independent.
    x = x_ref[...].astype(jnp.float32)
    inv_n = jnp.float32(1.0 / x.shape[-1])

    # Fused single pass: sum and sum of squares (one read of x from vregs).
    s = jnp.sum(x, axis=-1, keepdims=True)
    sq = jnp.sum(x * x, axis=-1, keepdims=True)

    mean = s * inv_n
    var = sq * inv_n - mean * mean            # biased variance (PyTorch LayerNorm)
    var = jnp.maximum(var, 0.0)               # guard E[x^2]-E[x]^2 cancellation
    inv_std = jax.lax.rsqrt(var + EPS)        # EUP slot — effectively free

    o_ref[...] = ((x - mean) * inv_std).astype(o_ref.dtype)


def _choose_row_block(B, F, dtype):
    """Pick TB: sublane-aligned, VMEM-budgeted, and >=2 grid steps when B allows."""
    itemsize = jnp.dtype(dtype).itemsize
    sublane = 8 if itemsize >= 4 else (16 if itemsize == 2 else 32)

    if B <= sublane:
        # Full-array block along rows.
        return B

    # VMEM budget: double-buffered input + output tiles.
    max_tb = max(1, _VMEM_TILE_BUDGET // (4 * F * itemsize))
    tb = min(max_tb, B)
    tb = max(sublane, (tb // sublane) * sublane)

    # Leave at least 2 grid steps so both v7x TensorCores get work.
    if tb >= B and B >= 2 * sublane:
        tb = max(sublane, ((B // 2) // sublane) * sublane)

    return min(tb, B)


def layer_norm(x):
    """LayerNorm over all non-batch dims, no affine params (matches the PyTorch module)."""
    orig_shape = x.shape
    B = orig_shape[0]
    F = 1
    for d in orig_shape[1:]:
        F *= d

    # Pure metadata reshape for contiguous NCHW; keeps last dim lane-dense.
    x2 = x.reshape(B, F)

    tb = _choose_row_block(B, F, x.dtype)
    grid = (pl.cdiv(B, tb),)
    itemsize = jnp.dtype(x.dtype).itemsize

    cost = pl.CostEstimate(
        flops=6 * B * F,                    # sum, sumsq (mul+add), sub, mul
        transcendentals=B,                  # one rsqrt per row
        bytes_accessed=2 * B * F * itemsize,
    )

    out = pl.pallas_call(
        _layernorm_kernel,
        out_shape=jax.ShapeDtypeStruct((B, F), x.dtype),
        grid_spec=pltpu.PrefetchScalarGridSpec(
            num_scalar_prefetch=0,
            grid=grid,
            in_specs=[pl.BlockSpec((tb, F), lambda b: (b, 0))],
            out_specs=pl.BlockSpec((tb, F), lambda b: (b, 0)),
        ),
        compiler_params=pltpu.CompilerParams(
            dimension_semantics=("parallel",),
        ),
        cost_estimate=cost,
    )(x2)

    return out.reshape(orig_shape)


if __name__ == "__main__":
    key = jax.random.PRNGKey(0)
    # B=2, C=4, H=W=16 -> F = 4*16*16 = 1024 (multiple of 128, lane-friendly)
    x = jax.random.normal(key, (2, 4, 16, 16), dtype=jnp.float32)

    y = layer_norm(x)
    jax.block_until_ready(y)

    # Sanity check against pure-JAX reference (PyTorch layer_norm semantics).
    xf = x.reshape(x.shape[0], -1).astype(jnp.float32)
    mean = jnp.mean(xf, axis=-1, keepdims=True)
    var = jnp.mean((xf - mean) ** 2, axis=-1, keepdims=True)
    ref = ((xf - mean) / jnp.sqrt(var + EPS)).reshape(x.shape)
    assert jnp.max(jnp.abs(y - ref)) < 1e-4

    print("KERNEL_OK")
</pallas_src>

<mosaic_0001>
module attributes {stable_mosaic.version = 11 : i64} {
  func.func @_layernorm_kernel(%arg0: i32, %arg1: memref<2x1024xf32, #tpu.memory_space<vmem>>, %arg2: memref<2x1024xf32, #tpu.memory_space<vmem>>) attributes {dimension_semantics = [#tpu.dimension_semantics<parallel>], iteration_bounds = array<i64: 1>, scalar_prefetch = 0 : i64, scratch_operands = 0 : i64, tpu.core_type = #tpu.core_type<tc>, window_params = [{transform_indices = @transform_0, window_bounds = array<i64: 2, 1024>}, {transform_indices = @transform_1, window_bounds = array<i64: 2, 1024>}]} {
    %c0 = arith.constant 0 : index
    %c0_0 = arith.constant 0 : index
    %0 = vector.load %arg1[%c0, %c0_0] : memref<2x1024xf32, #tpu.memory_space<vmem>>, vector<2x1024xf32>
    %cst = arith.constant dense<0.000000e+00> : vector<2xf32>
    %1 = vector.multi_reduction <add>, %0, %cst [1] : vector<2x1024xf32> to vector<2xf32>
    %2 = vector.shape_cast %1 : vector<2xf32> to vector<2x1xf32>
    %3 = arith.mulf %0, %0 : vector<2x1024xf32>
    %cst_1 = arith.constant dense<0.000000e+00> : vector<2xf32>
    %4 = vector.multi_reduction <add>, %3, %cst_1 [1] : vector<2x1024xf32> to vector<2xf32>
    %5 = vector.shape_cast %4 : vector<2xf32> to vector<2x1xf32>
    %cst_2 = arith.constant 9.765625E-4 : f32
    %6 = vector.broadcast %cst_2 : f32 to vector<2x1xf32>
    %7 = arith.mulf %2, %6 : vector<2x1xf32>
    %cst_3 = arith.constant 9.765625E-4 : f32
    %8 = vector.broadcast %cst_3 : f32 to vector<2x1xf32>
    %9 = arith.mulf %5, %8 : vector<2x1xf32>
    %10 = arith.mulf %7, %7 : vector<2x1xf32>
    %11 = arith.subf %9, %10 : vector<2x1xf32>
    %cst_4 = arith.constant 0.000000e+00 : f32
    %12 = vector.broadcast %cst_4 : f32 to vector<2x1xf32>
    %13 = arith.maximumf %11, %12 : vector<2x1xf32>
    %cst_5 = arith.constant 9.99999974E-6 : f32
    %14 = vector.broadcast %cst_5 : f32 to vector<2x1xf32>
    %15 = arith.addf %13, %14 : vector<2x1xf32>
    %16 = math.rsqrt %15 : vector<2x1xf32>
    %17 = vector.broadcast %7 : vector<2x1xf32> to vector<2x1024xf32>
    %18 = arith.subf %0, %17 : vector<2x1024xf32>
    %19 = vector.broadcast %16 : vector<2x1xf32> to vector<2x1024xf32>
    %20 = arith.mulf %18, %19 : vector<2x1024xf32>
    %c0_6 = arith.constant 0 : index
    %c0_7 = arith.constant 0 : index
    %21 = vector.load %arg2[%c0_6, %c0_7] : memref<2x1024xf32, #tpu.memory_space<vmem>>, vector<2x1024xf32>
    tpu.vector_store %arg2[%c0_6, %c0_7], %20 {strides = array<i32>} : memref<2x1024xf32, #tpu.memory_space<vmem>>, vector<2x1024xf32>,
    return
  }
  func.func @transform_0(%arg0: i32) -> (i32, i32) {
    %c0_i32 = arith.constant 0 : i32
    %c0_i32_0 = arith.constant 0 : i32
    return %arg0, %c0_i32 : i32, i32
  }
  func.func @transform_1(%arg0: i32) -> (i32, i32) {
    %c0_i32 = arith.constant 0 : i32
    %c0_i32_0 = arith.constant 0 : i32
    return %arg0, %c0_i32 : i32, i32
  }
}

</mosaic_0001>

<bundles_post_ra>
// kernel: tpu_custom_call.1
= control target key start
LH: loop header
LB: loop body
LE: loop exit
PB: predicated region body
PF: predicated region fallthrough
CT: control target
= control target key end

     0   :  { %6 = vsyncpa [#allocation3], 0  ;;  %s324_s0 = inlined_call_operand.hbm [shape: f32[2,1024], index: 0, kind: input, shape index: {}]   ;;  %s325_s1 = inlined_call_operand.hbm [shape: f32[2,1024], index: 1, kind: output, shape index: {}]  }
   0x1   :  { %7 = vsyncpa [#allocation4], 0  ;;  %s250_s6 = smov [#allocation2]   ;;  %s202_s10 = scalar_lea.hbm %s324_s0, 256 }
   0x2   :  { %s14_s7 = sshll.u32 %s250_s6, 4  ;;  %p203_p0 = scmp.ne.s32.totalorder %s324_s0, %s202_s10  ;;  %s15_s7 = int_to_ptr.vmem [resolvable:$true] %s14_s7 }
   0x3   :  { %p206_p1 = scmp.lt.u32.totalorder %s202_s10, %s324_s0 }
   0x5   :  { %p208_p2 = pnand %p206_p1, %p203_p0 }
   0x7   :  { %211 = shalt.err (!%p208_p2)
}
   0x8   :  { %s212_s15 = scalar_lea.vmem %s15_s7, 256  ;;  %p217_p4 = scmp.lt.s32.totalorder %s15_s7, %s15_s7 }
   0x9   :  { %p213_p3 = scmp.ne.s32.totalorder %s15_s7, %s212_s15  ;;  %p218_p5 = scmp.lt.s32.totalorder %s212_s15, %s212_s15 }
   0xb   :  { %p219_p6 = por %p218_p5, %p217_p4 }
   0xd   :  { %p220_p7 = pnand %p219_p6, %p213_p3 }
   0xf   :  { %223 = shalt.err (!%p220_p7)
}
  0x10   :  { %17 = dma.hbm_to_vmem [thread:$0]  %s324_s0, 256, %s15_s7, [#allocation3]  }
  0x11   :  { %246 = dma.done.wait [#allocation3], 256  }
  0x12   :  { %247 = vsyncadd [#allocation3], 4294967040  ;;  %v29_v0 = vlaneseq  ;;  %v251_v1 = vmov 1983009808   ;;  %v279_v6 = vld [vmem:[#allocation2] sm:$0xff]  ;;  %v281_v7 = vld [vmem:[#allocation2 + $0x8] sm:$0xff] }
  0x13   :  { %v27_v2 = vunpack.c.l.s4 %v251_v1  ;;  %v25_v8 = vcombine.high %v279_v6, %v279_v6  ;;  %vm67_vm0 = vcmask 1041408   ;;  %v42_v10 = vcombine.high %v281_v7, %v281_v7  ;;  %s253_s0 = smov [#allocation5]  }
  0x14   :  { %v276_v3 = vshrl.u32 %v29_v0, 7  ;;  %v85_v11 = vmul.f32 %v279_v6, %v279_v6  ;;  %v86_v16 = vmul.f32 %v281_v7, %v281_v7  ;;  %s185_s18 = sshll.u32 %s253_s0, 4  ;;  %s186_s18 = int_to_ptr.vmem [resolvable:$true] %s185_s18 }
  0x15   :  { %v28_v4 = vunpack.c.0.s8 %v27_v2  ;;  %v252_v2 = vmov 269488144   ;;  %s224_s19 = scalar_lea.vmem %s186_s18, 256  ;;  %p229_p9 = scmp.lt.s32.totalorder %s186_s18, %s186_s18 }
  0x16   :  { %v89_v17 = vcombine.high %v85_v11, %v85_v11  ;;  %v106_v28 = vcombine.high %v86_v16, %v86_v16  ;;  %p225_p8 = scmp.ne.s32.totalorder %s186_s18, %s224_s19  ;;  %p230_p10 = scmp.lt.s32.totalorder %s224_s19, %s224_s19 }
  0x17   :  { %v31_v5 = vsub.s32 %v28_v4, %v276_v3  ;;  %v157_v4 = vunpack.c.l.s4 %v252_v2 }
  0x18   :  { %p231_p11 = por %p230_p10, %p229_p9 }
  0x19   :  { %v32_v9 = vrot.slane %v279_v6, %v31_v5  ;;  %v39_v12 = vrot.slane %v25_v8, %v31_v5  ;;  %v49_v14 = vrot.slane %v281_v7, %v31_v5  ;;  %v96_v18 = vrot.slane %v85_v11, %v31_v5 }
  0x1a   :  { %v56_v22 = vrot.slane %v42_v10, %v31_v5  ;;  %v103_v24 = vrot.slane %v89_v17, %v31_v5  ;;  %v113_v31 = vrot.slane %v86_v16, %v31_v5  ;;  %v120_v40 = vrot.slane %v106_v28, %v31_v5  ;;  %p232_p12 = pnand %p231_p11, %p225_p8 }
  0x1b   :  { %v40_v13 = vcombine.high %v32_v9, %v32_v9  ;;  %v68_v15 = vsel %vm67_vm0, %v32_v9, 0.0  ;;  %v41_v19 = vcombine.high %v39_v12, %v39_v12  ;;  %v71_v21 = vsel %vm67_vm0, %v39_v12, 0.0 }
  0x1c   :  { %v57_v25 = vcombine.high %v49_v14, %v49_v14  ;;  %v104_v27 = vcombine.high %v96_v18, %v96_v18  ;;  %v105_v30 = vcombine.high %v103_v24, %v103_v24  ;;  %v131_v32 = vsel %vm67_vm0, %v96_v18, 0.0 }
  0x1d   :  { %v69_v20 = vsel %vm67_vm0, %v40_v13, 0.0  ;;  %v73_v26 = vsel %vm67_vm0, %v41_v19, 0.0  ;;  %v75_v33 = vsel %vm67_vm0, %v49_v14, 0.0  ;;  %v134_v35 = vsel %vm67_vm0, %v103_v24, 0.0 }
  0x1e   :  { %v70_v23 = vadd.f32 %v69_v20, %v68_v15  ;;  %v132_v34 = vsel %vm67_vm0, %v104_v27, 0.0  ;;  %v58_v36 = vcombine.high %v56_v22, %v56_v22  ;;  %v77_v39 = vsel %vm67_vm0, %v57_v25, 0.0 }
  0x1f   :  { %v133_v38 = vadd.f32 %v132_v34, %v131_v32  ;;  %v121_v41 = vcombine.high %v113_v31, %v113_v31  ;;  %v136_v42 = vsel %vm67_vm0, %v105_v30, 0.0  ;;  %v79_v45 = vsel %vm67_vm0, %v56_v22, 0.0 }
  0x20   :  { %v72_v29 = vadd.f32 %v71_v21, %v70_v23  ;;  %v138_v46 = vsel %vm67_vm0, %v113_v31, 0.0  ;;  %v81_v49 = vsel %vm67_vm0, %v58_v36, 0.0  ;;  %v122_v50 = vcombine.high %v120_v40, %v120_v40 }
  0x21   :  { %v135_v44 = vadd.f32 %v134_v35, %v133_v38  ;;  %v140_v51 = vsel %vm67_vm0, %v121_v41, 0.0  ;;  %v142_v54 = vsel %vm67_vm0, %v120_v40, 0.0  ;;  %v158_v9 = vunpack.c.0.s8 %v157_v4 }
  0x22   :  { %v74_v37 = vadd.f32 %v73_v26, %v72_v29  ;;  %v144_v57 = vsel %vm67_vm0, %v122_v50, 0.0 }
  0x23   :  { %v137_v48 = vadd.f32 %v136_v42, %v135_v44  ;;  %v161_v10 = vsub.s32 %v158_v9, %v276_v3 }
  0x24   :  { %v76_v43 = vadd.f32 %v75_v33, %v74_v37 }
  0x25   :  { %v139_v53 = vadd.f32 %v138_v46, %v137_v48 }
  0x26   :  { %v78_v47 = vadd.f32 %v77_v39, %v76_v43 }
  0x27   :  { %v141_v56 = vadd.f32 %v140_v51, %v139_v53 }
  0x28   :  { %v80_v52 = vadd.f32 %v79_v45, %v78_v47 }
  0x29   :  { %v143_v58 = vadd.f32 %v142_v54, %v141_v56 }
  0x2a   :  { %v82_v55 = vadd.f32 %v81_v49, %v80_v52 }
  0x2b   :  { %v145_v59 = vadd.f32 %v144_v57, %v143_v58 }
  0x2c   :  { %83 = vadd.xlane.f32.xlu0 %v82_v55 }
  0x30   :  { %146 = vadd.xlane.f32.xlu0 %v145_v59 }
  0xb9   :  { %v84_v60 = vpop.xlane.xlu0 %83 }
  0xba   :  { %v148_v61 = vmul.f32 0.0009765625, %v84_v60 }
  0xbc   :  { %v150_v63 = vmul.f32 %v148_v61, %v148_v61  ;;  %v162_v11 = vrot.slane %v148_v61, %v161_v10 }
  0xbd   :  { %v147_v62 = vpop.xlane.xlu0 %146 }
  0xbe   :  { %v149_v0 = vmul.f32 0.0009765625, %v147_v62  ;;  %v164_v13 = vsub.f32 %v279_v6, %v162_v11  ;;  %v165_v14 = vsub.f32 %v281_v7, %v162_v11 }
  0xc0   :  { %v151_v1 = vsub.f32 %v149_v0, %v150_v63 }
  0xc2   :  { %v152_v5 = vmax.f32 %v151_v1, 0.0 }
  0xc4   :  { %v153_v8 = vadd.f32 1e-05, %v152_v5 }
  0xc6   :  { %200 = vrsqrt.f32 %v153_v8 }
  0xd0   :  { %v201_v12 = vpop.eup %200 }
  0xd1   :  { %v173_v15 = vrot.slane %v201_v12, %v161_v10 }
  0xd3   :  { %v175_v16 = vmul.f32 %v173_v15, %v164_v13  ;;  %v176_v17 = vmul.f32 %v173_v15, %v165_v14 }
  0xd5   :  { %177 = vst [vmem:[#allocation5] sm:$0xff] %v175_v16  ;;  %178 = vst [vmem:[#allocation5 + $0x8] sm:$0xff] %v176_v17 }
  0xd6   :  { %235 = shalt.err (!%p232_p12)
}
  0xd7   :  { %s236_s22 = scalar_lea.hbm %s325_s1, 256 }
  0xd8   :  { %p237_p13 = scmp.ne.s32.totalorder %s325_s1, %s236_s22  ;;  %p240_p0 = scmp.lt.u32.totalorder %s236_s22, %s325_s1 }
  0xda   :  { %p242_p1 = pnand %p240_p0, %p237_p13 }
  0xdc   :  { %245 = shalt.err (!%p242_p1)
}
  0xdd   :  { %188 = dma.vmem_to_hbm [thread:$0]  %s186_s18, 256, %s325_s1, [#allocation4]  }
  0xde   :  { %248 = dma.done.wait [#allocation4], 256  }
  0xdf   :  { %249 = vsyncadd [#allocation4], 4294967040 }
  0xe0   :  { %192 = vsyncpa [#allocation3], 1 }
  0xe1   :  { %193 = vsyncpa [#allocation4], 1 }

</bundles_post_ra>
